<compile_context>
chip_gen: v5e
topology: v5e:2x2
jax: 0.10.0
libtpu: 0.0.40
codegen_flags: <defaults>
</compile_context>

<pallas_src>
import math

import jax
import jax.numpy as jnp
from jax.experimental import pallas as pl
from jax.experimental.pallas import tpu as pltpu


LANE = 128


def _round_up(x, m):
    return (x + m - 1) // m * m


# ------------------------------------------------------------------ kernel --

def fused_recon_pallas(tokens, temb_head, w_total, b_total, P):
    """out[b*P + p, :] = tokens[b*P + p, :] @ W_total + b_total + temb_head[b, :]

    tokens:    (M, K)   bf16, M = B*P, batch-major token rows
    temb_head: (B, Np)  f32  per-batch time embedding pushed through the head
    w_total:   (K, Np)  bf16 fully folded affine weight
    b_total:   (1, Np)  f32  fully folded affine bias
    returns    (M, Np)  f32  (lane-dense padded; caller crops to out_feat)
    """
    M, K = tokens.shape
    B, Np = temb_head.shape

    # Tiling policy: each grid step handles an integer number of whole batches
    # so the per-batch temb row is added with a static in-kernel loop.
    if M <= 256:
        bpt = B            # single block: whole problem in one grid step
    else:
        bpt = 1            # one batch per "parallel" step (per-batch temb DMA)
    n_tiles = B // bpt
    rows = bpt * P

    # temb as (n_tiles, bpt, Np): the block's last two dims always equal the
    # full array dims, keeping the (8,128) BlockSpec rule satisfied for any B.
    temb3 = temb_head.reshape(n_tiles, bpt, Np)

    def kernel(x_ref, temb_ref, w_ref, b_ref, o_ref):
        acc = jnp.dot(x_ref[...], w_ref[...],
                      preferred_element_type=jnp.float32)
        acc = acc + b_ref[...]
        temb = temb_ref[0]                                  # (bpt, Np) f32
        for bb in range(bpt):                               # static unroll
            o_ref[pl.ds(bb * P, P), :] = (
                acc[bb * P:(bb + 1) * P, :] + temb[bb:bb + 1, :]
            ).astype(o_ref.dtype)

    return pl.pallas_call(
        kernel,
        out_shape=jax.ShapeDtypeStruct((M, Np), jnp.float32),
        grid=(n_tiles,),
        in_specs=[
            pl.BlockSpec((rows, K), lambda i: (i, 0)),
            pl.BlockSpec((1, bpt, Np), lambda i: (i, 0, 0)),
            pl.BlockSpec((K, Np), lambda i: (0, 0)),
            pl.BlockSpec((1, Np), lambda i: (0, 0)),
        ],
        out_specs=pl.BlockSpec((rows, Np), lambda i: (i, 0)),
        compiler_params=pltpu.CompilerParams(
            dimension_semantics=("parallel",)),
    )(tokens, temb3, w_total, b_total)


# ---------------------------------------------------------- plain-JAX glue --

def fourier_expansion(x, lower, upper, d):
    """FourierExpansion(lower, upper, d): x (B,) -> (B, d) = [sin | cos]."""
    if d % 2 != 0:
        raise ValueError("FourierExpansion requires an even embedding dim")
    half = d // 2
    wavelengths = jnp.logspace(math.log10(lower), math.log10(upper), half,
                               dtype=jnp.float32)
    ang = (x.astype(jnp.float32)[:, None] / wavelengths[None, :]) * (2.0 * math.pi)
    return jnp.concatenate([jnp.sin(ang), jnp.cos(ang)], axis=-1)


# --------------------------------------------------------------- the module --

class PoseidonReconPallas:
    def __init__(self, in_img_size=(14, 15), variables=3, n_level=4,
                 patch_size=4, hidden_size=32, latent_levels=2, seed=0):
        self.pad_size_h = 0
        self.pad_size_w = 0
        self.padding = False
        if in_img_size[0] % patch_size != 0 or in_img_size[1] % patch_size != 0:
            self.padding = True
            self.pad_size_h = patch_size - in_img_size[0] % patch_size
            self.pad_size_w = patch_size - in_img_size[1] % patch_size
            in_img_size = (in_img_size[0] + self.pad_size_h,
                           in_img_size[1] + self.pad_size_w)
        self.in_img_size = in_img_size
        self.variables = variables
        self.n_level = n_level
        self.patch_size = patch_size
        self.hidden_size = hidden_size
        self.latent_levels = latent_levels

        p = patch_size
        self.h_p = in_img_size[0] // p
        self.w_p = in_img_size[1] // p
        self.num_patches = self.h_p * self.w_p

        D = hidden_size
        L = latent_levels
        self.in_feat = variables * n_level * p * p
        self.out_feat = variables * n_level * p * p
        self.Np = _round_up(self.out_feat, LANE)     # lane-dense head output

        # Deterministic parameter init (trunc_normal_(std=0.02), zero biases).
        key = jax.random.PRNGKey(seed)
        k1, k2, k3 = jax.random.split(key, 3)

        def tn(k, shape):
            return 0.02 * jax.random.truncated_normal(k, -2.0, 2.0, shape,
                                                      dtype=jnp.float32)

        # Raw (unfolded) f32 params -- kept for the pure-JAX reference.
        self.w_embed = tn(k1, (self.in_feat, D))
        self.b_embed = jnp.zeros((D,), jnp.float32)
        self.w_level = tn(k2, (D, L * D))
        self.b_level = jnp.zeros((L * D,), jnp.float32)
        self.w_head = tn(k3, (D, self.out_feat))
        self.b_head = jnp.zeros((self.out_feat,), jnp.float32)
        self.level_weights = jnp.full((L,), 1.0 / L, jnp.float32)

        # --- fold the latent-level combine into the level linear -----------
        #   z = sum_l w_l*(emb @ W_l + b_l + temb)
        #     = emb @ W_eff + b_eff + (sum_l w_l) * temb
        w_eff = (self.w_level.reshape(D, L, D)
                 * self.level_weights[None, :, None]).sum(axis=1)       # (D,D)
        b_eff = (self.b_level.reshape(L, D)
                 * self.level_weights[:, None]).sum(axis=0)             # (D,)
        self.temb_scale = self.level_weights.sum()

        # --- fold the whole affine chain (valid while no transformer blocks):
        #   rec = tok @ (We @ W_eff @ Wh)
        #         + [(be @ W_eff + b_eff) @ Wh + bh]
        #         + s * (temb @ Wh)
        w_total = self.w_embed @ w_eff @ self.w_head          # (in_feat, out)
        b_total = (self.b_embed @ w_eff + b_eff) @ self.w_head + self.b_head

        dN = self.Np - self.out_feat
        self.w_total_p = jnp.pad(w_total, ((0, 0), (0, dN))).astype(jnp.bfloat16)
        self.b_total_p = jnp.pad(b_total, (0, dN)).reshape(1, self.Np)

        self._jitted = jax.jit(self._forward)

    # ---------------- glue helpers (plain JAX) ----------------
    def _pad(self, x):
        # torch.nn.functional.pad(x, (pad_w, 0, pad_h, 0)): W left, H top.
        return jnp.pad(x, ((0, 0), (0, 0), (0, 0),
                           (self.pad_size_h, 0), (self.pad_size_w, 0)))

    def _patchify(self, x):
        # x: (B, C, N, Hp, Wp) -> (B, P, C*N*p*p)
        B = x.shape[0]
        p = self.patch_size
        x = x.reshape(B, self.variables * self.n_level, self.h_p, p, self.w_p, p)
        x = jnp.transpose(x, (0, 2, 4, 1, 3, 5))
        return x.reshape(B, self.num_patches, -1)

    def _unpatchify(self, tok, B):
        # tok: (B, P, V*N*p*p) -> (B, V, N, Hp, Wp)
        p = self.patch_size
        V, N = self.variables, self.n_level
        x = tok.reshape(B, self.h_p, self.w_p, V, N, p, p)
        x = jnp.transpose(x, (0, 3, 4, 1, 5, 2, 6))
        return x.reshape(B, V, N, self.h_p * p, self.w_p * p)

    # ---------------- forward ----------------
    def _forward(self, x, x_mark, y_mark):
        B = x.shape[0]
        D = self.hidden_size
        P = self.num_patches

        if self.padding:
            x = self._pad(x)

        tokens = self._patchify(x).reshape(B * P, -1).astype(jnp.bfloat16)

        # Fourier time embeddings (tiny -> plain jnp, no kernel launch).
        x_time_emb = (fourier_expansion(x_mark[:, 0], 1.0, 12.0, D)
                      + fourier_expansion(x_mark[:, 1], 1.0, 31.0, D))
        # Mirrors the reference forward; unused and DCE'd by jax.jit.
        y_time_emb = (fourier_expansion(y_mark[:, 0], 1.0, 12.0, D)
                      + fourier_expansion(y_mark[:, 1], 1.0, 31.0, D))
        del y_time_emb

        # Per-batch time embedding pushed through the head (B x Np, f32).
        temb_head = (self.temb_scale * x_time_emb) @ self.w_head       # (B, out)
        temb_head = jnp.pad(temb_head,
                            ((0, 0), (0, self.Np - self.out_feat)))    # (B, Np)

        # ---- single fused Pallas kernel for the whole token path ----
        rec_p = fused_recon_pallas(tokens, temb_head,
                                   self.w_total_p, self.b_total_p, P)  # (M, Np)
        rec = rec_p[:, :self.out_feat]

        out = self._unpatchify(rec.reshape(B, P, -1), B)        # (B,V,N,Hp,Wp)
        out = out[:, :, :, self.pad_size_h:, self.pad_size_w:]
        return out

    def __call__(self, x, x_mark, y_mark):
        return self._jitted(x, x_mark, y_mark)

    # pure-JAX f32 reference of the (unfolded) structural forward path
    def reference(self, x, x_mark):
        B = x.shape[0]
        D, L, P = self.hidden_size, self.latent_levels, self.num_patches
        xp = self._pad(x) if self.padding else x
        tokens = self._patchify(xp).reshape(B * P, -1)
        emb = tokens @ self.w_embed + self.b_embed
        lvl = emb @ self.w_level + self.b_level
        lat = lvl.reshape(B, P, L, D).transpose(0, 2, 1, 3)
        temb = (fourier_expansion(x_mark[:, 0], 1.0, 12.0, D)
                + fourier_expansion(x_mark[:, 1], 1.0, 31.0, D))
        z = ((lat + temb[:, None, None, :])
             * self.level_weights[None, :, None, None]).sum(axis=1)
        rec = z.reshape(B * P, D) @ self.w_head + self.b_head
        out = self._unpatchify(rec.reshape(B, P, -1), B)
        return out[:, :, :, self.pad_size_h:, self.pad_size_w:]


# ------------------------------------------------------------------- driver --

if __name__ == "__main__":
    B = 2
    variables = 3
    n_level = 4
    in_img_size = (14, 15)    # not divisible by patch -> exercises padding path
    patch_size = 4
    hidden_size = 32
    latent_levels = 2

    model = PoseidonReconPallas(in_img_size=in_img_size, variables=variables,
                                n_level=n_level, patch_size=patch_size,
                                hidden_size=hidden_size,
                                latent_levels=latent_levels, seed=0)

    key = jax.random.PRNGKey(0)
    kx, km, ky = jax.random.split(key, 3)
    x = jax.random.normal(kx, (B, variables, n_level,
                               in_img_size[0], in_img_size[1]), jnp.float32)
    # (month, day) marks
    x_mark = jnp.stack(
        [jax.random.randint(km, (B,), 1, 13).astype(jnp.float32),
         jax.random.randint(km, (B,), 1, 32).astype(jnp.float32)], axis=1)
    y_mark = jnp.stack(
        [jax.random.randint(ky, (B,), 1, 13).astype(jnp.float32),
         jax.random.randint(ky, (B,), 1, 32).astype(jnp.float32)], axis=1)

    out = model(x, x_mark, y_mark)
    out = jax.block_until_ready(out)
    assert out.shape == (B, variables, n_level, in_img_size[0], in_img_size[1])

    # sanity check against the pure-JAX f32 reference (bf16 MXU tolerance)
    ref = jax.block_until_ready(model.reference(x, x_mark))
    assert jnp.allclose(out, ref, atol=2e-2, rtol=2e-2), (
        float(jnp.max(jnp.abs(out - ref))))

    print("KERNEL_OK")
</pallas_src>

<mosaic_0001>
module attributes {stable_mosaic.version = 11 : i64} {
  func.func @kernel(%arg0: i32, %arg1: memref<32x192xbf16, #tpu.memory_space<vmem>>, %arg2: memref<1x2x256xf32, #tpu.memory_space<vmem>>, %arg3: memref<192x256xbf16, #tpu.memory_space<vmem>>, %arg4: memref<1x256xf32, #tpu.memory_space<vmem>>, %arg5: memref<32x256xf32, #tpu.memory_space<vmem>>) attributes {dimension_semantics = [#tpu.dimension_semantics<parallel>], iteration_bounds = array<i64: 1>, scalar_prefetch = 0 : i64, scratch_operands = 0 : i64, tpu.core_type = #tpu.core_type<tc>, window_params = [{transform_indices = @transform_0, window_bounds = array<i64: 32, 192>}, {transform_indices = @transform_1, window_bounds = array<i64: 1, 2, 256>}, {pipeline_mode = #tpu.pipeline_mode<synchronous>, transform_indices = @transform_2, window_bounds = array<i64: 192, 256>}, {pipeline_mode = #tpu.pipeline_mode<synchronous>, transform_indices = @transform_3, window_bounds = array<i64: 1, 256>}, {transform_indices = @transform_4, window_bounds = array<i64: 32, 256>}]} {
    %c0 = arith.constant 0 : index
    %c0_0 = arith.constant 0 : index
    %0 = vector.load %arg1[%c0, %c0_0] : memref<32x192xbf16, #tpu.memory_space<vmem>>, vector<32x192xbf16>
    %c0_1 = arith.constant 0 : index
    %c0_2 = arith.constant 0 : index
    %1 = vector.load %arg3[%c0_1, %c0_2] : memref<192x256xbf16, #tpu.memory_space<vmem>>, vector<192x256xbf16>
    %cst = arith.constant dense<0.000000e+00> : vector<32x256xf32>
    %2 = tpu.matmul %0, %1, %cst {dimension_numbers = #tpu.dot_dimension_numbers<[1], [0], [0], [1], [0, 0, 1, 1], [], []>} : vector<32x192xbf16>, vector<192x256xbf16>, vector<32x256xf32> -> vector<32x256xf32>
    %c0_3 = arith.constant 0 : index
    %c0_4 = arith.constant 0 : index
    %3 = vector.load %arg4[%c0_3, %c0_4] : memref<1x256xf32, #tpu.memory_space<vmem>>, vector<1x256xf32>
    %4 = vector.broadcast %3 : vector<1x256xf32> to vector<32x256xf32>
    %5 = arith.addf %2, %4 : vector<32x256xf32>
    %c0_5 = arith.constant 0 : index
    %c0_6 = arith.constant 0 : index
    %c0_7 = arith.constant 0 : index
    %6 = vector.load %arg2[%c0_5, %c0_6, %c0_7] : memref<1x2x256xf32, #tpu.memory_space<vmem>>, vector<1x2x256xf32>
    %7 = vector.shape_cast %6 : vector<1x2x256xf32> to vector<2x256xf32>
    %8 = vector.extract_strided_slice %5 {offsets = [0, 0], sizes = [16, 256], strides = [1, 1]} : vector<32x256xf32> to vector<16x256xf32>
    %9 = vector.extract_strided_slice %7 {offsets = [0, 0], sizes = [1, 256], strides = [1, 1]} : vector<2x256xf32> to vector<1x256xf32>
    %10 = vector.broadcast %9 : vector<1x256xf32> to vector<16x256xf32>
    %11 = arith.addf %8, %10 : vector<16x256xf32>
    %c0_8 = arith.constant 0 : index
    %c0_9 = arith.constant 0 : index
    %12 = vector.load %arg5[%c0_8, %c0_9] : memref<32x256xf32, #tpu.memory_space<vmem>>, vector<16x256xf32>
    tpu.vector_store %arg5[%c0_8, %c0_9], %11 {strides = array<i32>} : memref<32x256xf32, #tpu.memory_space<vmem>>, vector<16x256xf32>,
    %13 = vector.extract_strided_slice %5 {offsets = [16, 0], sizes = [16, 256], strides = [1, 1]} : vector<32x256xf32> to vector<16x256xf32>
    %14 = vector.extract_strided_slice %7 {offsets = [1, 0], sizes = [1, 256], strides = [1, 1]} : vector<2x256xf32> to vector<1x256xf32>
    %15 = vector.broadcast %14 : vector<1x256xf32> to vector<16x256xf32>
    %16 = arith.addf %13, %15 : vector<16x256xf32>
    %c16 = arith.constant 16 : index
    %c0_10 = arith.constant 0 : index
    %17 = vector.load %arg5[%c16, %c0_10] : memref<32x256xf32, #tpu.memory_space<vmem>>, vector<16x256xf32>
    tpu.vector_store %arg5[%c16, %c0_10], %16 {strides = array<i32>} : memref<32x256xf32, #tpu.memory_space<vmem>>, vector<16x256xf32>,
    return
  }
  func.func @transform_0(%arg0: i32) -> (i32, i32) {
    %c0_i32 = arith.constant 0 : i32
    %c0_i32_0 = arith.constant 0 : i32
    return %arg0, %c0_i32 : i32, i32
  }
  func.func @transform_1(%arg0: i32) -> (i32, i32, i32) {
    %c0_i32 = arith.constant 0 : i32
    %c0_i32_0 = arith.constant 0 : i32
    %c0_i32_1 = arith.constant 0 : i32
    return %arg0, %c0_i32, %c0_i32_0 : i32, i32, i32
  }
  func.func @transform_2(%arg0: i32) -> (i32, i32) {
    %c0_i32 = arith.constant 0 : i32
    %c0_i32_0 = arith.constant 0 : i32
    %c0_i32_1 = arith.constant 0 : i32
    return %c0_i32, %c0_i32_0 : i32, i32
  }
  func.func @transform_3(%arg0: i32) -> (i32, i32) {
    %c0_i32 = arith.constant 0 : i32
    %c0_i32_0 = arith.constant 0 : i32
    %c0_i32_1 = arith.constant 0 : i32
    return %c0_i32, %c0_i32_0 : i32, i32
  }
  func.func @transform_4(%arg0: i32) -> (i32, i32) {
    %c0_i32 = arith.constant 0 : i32
    %c0_i32_0 = arith.constant 0 : i32
    return %arg0, %c0_i32 : i32, i32
  }
}

</mosaic_0001>

<bundles_post_ra>
// kernel: _forward.1
= control target key start
LH: loop header
LB: loop body
LE: loop exit
PB: predicated region body
PF: predicated region fallthrough
CT: control target
= control target key end

     0   :  { %vm190_vm0 = vcmask 523264   ;;  %s678_s2 = inlined_call_operand.vmem [shape: bf16[192,256], index: 2, kind: input, shape index: {}]   ;;  %s679_s0 = inlined_call_operand.vmem [shape: bf16[32,192], index: 0, kind: input, shape index: {}]   ;;  %s680_s3 = inlined_call_operand.vmem [shape: f32[1,256], index: 3, kind: input, shape index: {}]   ;;  %s681_s1 = inlined_call_operand.vmem [shape: f32[1,2,256], index: 1, kind: input, shape index: {}]   ;;  %s682_s4 = inlined_call_operand.vmem [shape: f32[32,256], index: 4, kind: output, shape index: {}]  }
   0x1   :  { %v381_v0 = vld [vmem:[%s678_s2 + $0x70] sm:$0xf]  ;;  %v442_v1 = vld [vmem:[%s678_s2 + $0x74] sm:$0xf0]  ;;  %v441_v2 = vld [vmem:[%s678_s2 + $0x74] sm:$0xf] }
   0x2   :  { %v382_v3 = vor.u32 %v442_v1, %v381_v0  ;;  %v383_v4 = vld [vmem:[%s678_s2 + $0x78] sm:$0xf0]  ;;  %v373_v5 = vld [vmem:[%s678_s2 + $0x60] sm:$0xf]  ;;  %v440_v6 = vld [vmem:[%s678_s2 + $0x64] sm:$0xf0] }
   0x3   :  { %v386_v7 = vor.u32 %v441_v2, %v383_v4  ;;  %v439_v8 = vld [vmem:[%s678_s2 + $0x64] sm:$0xf]  ;;  %v375_v9 = vld [vmem:[%s678_s2 + $0x68] sm:$0xf0]  ;;  %v374_v10 = vor.u32 %v440_v6, %v373_v5  ;;  %v365_v11 = vld [vmem:[%s678_s2 + $0x50] sm:$0xf] }
   0x4   :  { %197 = vmatpush.bf16.msra.mxu0 %v382_v3  ;;  %v378_v12 = vor.u32 %v439_v8, %v375_v9  ;;  %v438_v13 = vld [vmem:[%s678_s2 + $0x54] sm:$0xf0]  ;;  %v449_v14 = vld [vmem:[%s678_s2 + $0xb4] sm:$0xf]  ;;  %v415_v15 = vld [vmem:[%s678_s2 + $0xb8] sm:$0xf0] }
   0x5   :  { %235 = vmatpush.bf16.msra.mxu2 %v386_v7  ;;  %v437_v16 = vld [vmem:[%s678_s2 + $0x54] sm:$0xf]  ;;  %v367_v17 = vld [vmem:[%s678_s2 + $0x58] sm:$0xf0]  ;;  %v418_v18 = vor.u32 %v449_v14, %v415_v15  ;;  %v447_v19 = vld [vmem:[%s678_s2 + $0xa4] sm:$0xf]  ;;  %v366_v21 = vor.u32 %v438_v13, %v365_v11 }
   0x6   :  { %v407_v20 = vld [vmem:[%s678_s2 + $0xa8] sm:$0xf0]  ;;  %v413_v23 = vld [vmem:[%s678_s2 + $0xb0] sm:$0xf]  ;;  %v450_v24 = vld [vmem:[%s678_s2 + $0xb4] sm:$0xf0]  ;;  %v370_v25 = vor.u32 %v437_v16, %v367_v17 }
   0x7   :  { %258 = vmatpush.bf16.msra.mxu3 %v418_v18  ;;  %v410_v22 = vor.u32 %v447_v19, %v407_v20  ;;  %v357_v26 = vld [vmem:[%s678_s2 + $0x40] sm:$0xf]  ;;  %v436_v27 = vld [vmem:[%s678_s2 + $0x44] sm:$0xf0]  ;;  %v414_v28 = vor.u32 %v450_v24, %v413_v23  ;;  %v445_v29 = vld [vmem:[%s678_s2 + $0x94] sm:$0xf] }
   0x8   :  { %198 = vmatpush.bf16.msra.mxu0 %v374_v10  ;;  %v435_v30 = vld [vmem:[%s678_s2 + $0x44] sm:$0xf]  ;;  %v359_v31 = vld [vmem:[%s678_s2 + $0x48] sm:$0xf0]  ;;  %v399_v32 = vld [vmem:[%s678_s2 + $0x98] sm:$0xf0]  ;;  %v358_v35 = vor.u32 %v436_v27, %v357_v26 }
   0x9   :  { %236 = vmatpush.bf16.msra.mxu2 %v378_v12  ;;  %220 = vmatpush.bf16.msra.mxu1 %v414_v28  ;;  %v405_v33 = vld [vmem:[%s678_s2 + $0xa0] sm:$0xf]  ;;  %v448_v34 = vld [vmem:[%s678_s2 + $0xa4] sm:$0xf0]  ;;  %v349_v36 = vld [vmem:[%s678_s2 + $0x30] sm:$0xf]  ;;  %v402_v38 = vor.u32 %v445_v29, %v399_v32  ;;  %v362_v40 = vor.u32 %v435_v30, %v359_v31 }
   0xa   :  { %v434_v37 = vld [vmem:[%s678_s2 + $0x34] sm:$0xf0]  ;;  %v406_v39 = vor.u32 %v448_v34, %v405_v33  ;;  %v443_v41 = vld [vmem:[%s678_s2 + $0x84] sm:$0xf]  ;;  %v391_v42 = vld [vmem:[%s678_s2 + $0x88] sm:$0xf0] }
   0xb   :  { %259 = vmatpush.bf16.msra.mxu3 %v410_v22  ;;  %v397_v43 = vld [vmem:[%s678_s2 + $0x90] sm:$0xf]  ;;  %v433_v44 = vld [vmem:[%s678_s2 + $0x34] sm:$0xf]  ;;  %v351_v45 = vld [vmem:[%s678_s2 + $0x38] sm:$0xf0]  ;;  %v350_v49 = vor.u32 %v434_v37, %v349_v36  ;;  %v394_v50 = vor.u32 %v443_v41, %v391_v42 }
   0xc   :  { %199 = vmatpush.bf16.msra.mxu0 %v366_v21  ;;  %v446_v46 = vld [vmem:[%s678_s2 + $0x94] sm:$0xf0]  ;;  %v423_v48 = vld [vmem:[%s679_s0 + $0x4] sm:$0xf]  ;;  %v311_v51 = vld [vmem:[%s679_s0 + $0x8] sm:$0xf0]  ;;  %v354_v54 = vor.u32 %v433_v44, %v351_v45 }
   0xd   :  { %237 = vmatpush.bf16.msra.mxu2 %v370_v25  ;;  %221 = vmatpush.bf16.msra.mxu1 %v406_v39  ;;  %v398_v47 = vor.u32 %v446_v46, %v397_v43  ;;  %v389_v52 = vld [vmem:[%s678_s2 + $0x80] sm:$0xf]  ;;  %v444_v53 = vld [vmem:[%s678_s2 + $0x84] sm:$0xf0]  ;;  %v431_v57 = vld [vmem:[%s678_s2 + $0x24] sm:$0xf]  ;;  %v314_v59 = vor.u32 %v423_v48, %v311_v51 }
   0xe   :  { %v341_v55 = vld [vmem:[%s678_s2 + $0x20] sm:$0xf]  ;;  %v432_v56 = vld [vmem:[%s678_s2 + $0x24] sm:$0xf0]  ;;  %v343_v58 = vld [vmem:[%s678_s2 + $0x28] sm:$0xf0]  ;;  %v390_v60 = vor.u32 %v444_v53, %v389_v52 }
   0xf   :  { %260 = vmatpush.bf16.msra.mxu3 %v402_v38  ;;  %v342_v61 = vor.u32 %v432_v56, %v341_v55  ;;  %v346_v62 = vor.u32 %v431_v57, %v343_v58  ;;  %v333_v63 = vld [vmem:[%s678_s2 + $0x10] sm:$0xf]  ;;  %v430_v0 = vld [vmem:[%s678_s2 + $0x14] sm:$0xf0]  ;;  %v429_v1 = vld [vmem:[%s678_s2 + $0x14] sm:$0xf] }
  0x10   :  { %200 = vmatpush.bf16.msra.mxu0 %v358_v35  ;;  %v335_v2 = vld [vmem:[%s678_s2 + $0x18] sm:$0xf0]  ;;  %v334_v3 = vor.u32 %v430_v0, %v333_v63  ;;  %v325_v5 = vld [vmem:[%s678_s2] sm:$0xf]  ;;  %v428_v6 = vld [vmem:[%s678_s2 + $0x4] sm:$0xf0] }
  0x11   :  { %238 = vmatpush.bf16.msra.mxu2 %v362_v40  ;;  %222 = vmatpush.bf16.msra.mxu1 %v398_v47  ;;  %v338_v4 = vor.u32 %v429_v1, %v335_v2  ;;  %v427_v7 = vld [vmem:[%s678_s2 + $0x4] sm:$0xf]  ;;  %v327_v8 = vld [vmem:[%s678_s2 + $0x8] sm:$0xf0]  ;;  %v326_v9 = vor.u32 %v428_v6, %v325_v5  ;;  %v309_v10 = vld [vmem:[%s679_s0] sm:$0xf] }
  0x12   :  { %v424_v11 = vld [vmem:[%s679_s0 + $0x4] sm:$0xf0]  ;;  %v330_v12 = vor.u32 %v427_v7, %v327_v8  ;;  %v425_v14 = vld [vmem:[%s679_s0 + $0x14] sm:$0xf]  ;;  %v319_v15 = vld [vmem:[%s679_s0 + $0x18] sm:$0xf0] }
  0x13   :  { %261 = vmatpush.bf16.msra.mxu3 %v394_v50  ;;  %v310_v13 = vor.u32 %v424_v11, %v309_v10  ;;  %v322_v16 = vor.u32 %v425_v14, %v319_v15  ;;  %v317_v17 = vld [vmem:[%s679_s0 + $0x10] sm:$0xf]  ;;  %v426_v18 = vld [vmem:[%s679_s0 + $0x14] sm:$0xf0]  ;;  %v46_v20 = vld [vmem:[%s680_s3] sm:$0x3] }
  0x14   :  { %201 = vmatpush.bf16.msra.mxu0 %v350_v49  ;;  %v318_v19 = vor.u32 %v426_v18, %v317_v17  ;;  %v273_v21 = vld [vmem:[%s681_s1] sm:$0xf]  ;;  %v48_v23 = vperm.slane %v46_v20, 0  ;;  %v49_v30 = vperm.slane %v46_v20, 1 }
  0x15   :  { %239 = vmatpush.bf16.msra.mxu2 %v354_v54  ;;  %223 = vmatpush.bf16.msra.mxu1 %v390_v60  ;;  %v275_v24 = vperm.slane %v273_v21, 0  ;;  %v276_v31 = vperm.slane %v273_v21, 2  ;;  %v289_v44 = vperm.slane %v273_v21, 1  ;;  %v290_v54 = vperm.slane %v273_v21, 3 }
  0x16   :  { %421 = vmatmul.msk.bf16.vlgmr.msra.gmra.mxu3 %vm190_vm0, %v314_v59 }
  0x17   :  { %v279_v27 = vperm.slane %v275_v24, 0  ;;  %v280_v36 = vperm.slane %v276_v31, 0  ;;  %v293_v50 = vperm.slane %v289_v44, 1 }
  0x18   :  { %202 = vmatpush.bf16.msra.mxu0 %v342_v61  ;;  %419 = vmatmul.msk.bf16.vlgmr.msra.gmra.mxu1 %vm190_vm0, %v314_v59  ;;  %v294_v59 = vperm.slane %v290_v54, 1 }
  0x19   :  { %240 = vmatpush.bf16.msra.mxu2 %v346_v62 }
  0x1c   :  { %203 = vmatpush.bf16.msra.mxu0 %v334_v3 }
  0x1d   :  { %241 = vmatpush.bf16.msra.mxu2 %v338_v4 }
  0x20   :  { %204 = vmatpush.bf16.msra.mxu0 %v326_v9 }
  0x21   :  { %242 = vmatpush.bf16.msra.mxu2 %v330_v12 }
  0x23   :  { %205 = vmatmul.bf16.vlgmr.msra.gmra.mxu0 %v310_v13 }
  0x24   :  { %243 = vmatmul.bf16.vlgmr.msra.gmra.mxu2 %v310_v13 }
  0x26   :  { %422 = vmatmul.msk.bf16.gmra.mxu3 %vm190_vm0, %v322_v16 }
  0x28   :  { %420 = vmatmul.msk.bf16.gmra.mxu1 %vm190_vm0, %v322_v16 }
  0x33   :  { %210 = vmatmul.bf16.gmra.mxu0 %v318_v19 }
  0x34   :  { %248 = vmatmul.bf16.gmra.mxu2 %v318_v19 }
  0x95   :  { %v225_v22 = vpop.f32.mrf.mxu1 }
  0x99   :  { %v263_v29 = vpop.f32.mrf.mxu3 }
  0x9d   :  { %v227_v33 = vpop.f32.mrf.mxu1 }
  0xa0   :  { %v206_v25 = vpop.f32.mrf.mxu0 }
  0xa1   :  { %v207_v26 = vadd.f32 %v206_v25, %v48_v23  ;;  %v265_v43 = vpop.f32.mrf.mxu3 }
  0xa3   :  { %v226_v28 = vadd.f32 %v225_v22, %v207_v26 }
  0xa5   :  { %v281_v32 = vadd.f32 %v279_v27, %v226_v28  ;;  %v230_v48 = vpop.f32.mrf.mxu1 }
  0xa7   :  { %285 = vst [vmem:[%s682_s4] sm:$0xff] %v281_v32  ;;  %v244_v34 = vpop.f32.mrf.mxu2 }
  0xa8   :  { %v245_v35 = vadd.f32 %v244_v34, %v49_v30  ;;  %v208_v37 = vpop.f32.mrf.mxu0 }
  0xa9   :  { %v209_v38 = vadd.f32 %v208_v37, %v48_v23  ;;  %v268_v56 = vpop.f32.mrf.mxu3 }
  0xaa   :  { %v264_v39 = vadd.f32 %v263_v29, %v245_v35 }
  0xab   :  { %v228_v40 = vadd.f32 %v227_v33, %v209_v38 }
  0xac   :  { %v282_v41 = vadd.f32 %v280_v36, %v264_v39 }
  0xad   :  { %v283_v42 = vadd.f32 %v279_v27, %v228_v40  ;;  %v232_v63 = vpop.f32.mrf.mxu1 }
  0xae   :  { %286 = vst [vmem:[%s682_s4 + $0x8] sm:$0xff] %v282_v41 }
  0xaf   :  { %287 = vst [vmem:[%s682_s4 + $0x10] sm:$0xff] %v283_v42  ;;  %v246_v45 = vpop.f32.mrf.mxu2 }
  0xb0   :  { %v247_v46 = vadd.f32 %v246_v45, %v49_v30  ;;  %v211_v47 = vpop.f32.mrf.mxu0 }
  0xb1   :  { %v212_v49 = vadd.f32 %v211_v47, %v48_v23  ;;  %v270_v5 = vpop.f32.mrf.mxu3 }
  0xb2   :  { %v266_v51 = vadd.f32 %v265_v43, %v247_v46 }
  0xb3   :  { %v231_v52 = vadd.f32 %v230_v48, %v212_v49 }
  0xb4   :  { %v284_v53 = vadd.f32 %v280_v36, %v266_v51 }
  0xb5   :  { %v295_v55 = vadd.f32 %v293_v50, %v231_v52 }
  0xb6   :  { %288 = vst [vmem:[%s682_s4 + $0x18] sm:$0xff] %v284_v53 }
  0xb7   :  { %299 = vst [vmem:[%s682_s4 + $0x20] sm:$0xff] %v295_v55  ;;  %v249_v57 = vpop.f32.mrf.mxu2 }
  0xb8   :  { %v250_v58 = vadd.f32 %v249_v57, %v49_v30  ;;  %v213_v60 = vpop.f32.mrf.mxu0 }
  0xb9   :  { %v214_v61 = vadd.f32 %v213_v60, %v48_v23 }
  0xba   :  { %v269_v62 = vadd.f32 %v268_v56, %v250_v58 }
  0xbb   :  { %v233_v0 = vadd.f32 %v232_v63, %v214_v61 }
  0xbc   :  { %v296_v1 = vadd.f32 %v294_v59, %v269_v62 }
  0xbd   :  { %v297_v2 = vadd.f32 %v293_v50, %v233_v0 }
  0xbe   :  { %300 = vst [vmem:[%s682_s4 + $0x28] sm:$0xff] %v296_v1 }
  0xbf   :  { %301 = vst [vmem:[%s682_s4 + $0x30] sm:$0xff] %v297_v2  ;;  %v251_v3 = vpop.f32.mrf.mxu2 }
  0xc0   :  { %v252_v4 = vadd.f32 %v251_v3, %v49_v30 }
  0xc2   :  { %v271_v6 = vadd.f32 %v270_v5, %v252_v4 }
  0xc4   :  { %v298_v7 = vadd.f32 %v294_v59, %v271_v6 }
  0xc6   :  { %302 = vst [vmem:[%s682_s4 + $0x38] sm:$0xff] %v298_v7 }

</bundles_post_ra>
